<compile_context>
chip_gen: v6e
topology: v6e:2x2x1
jax: 0.10.0
libtpu: 0.0.40
codegen_flags: <defaults>
</compile_context>

<pallas_src>
import jax
import jax.numpy as jnp
from jax import lax
from jax.experimental import pallas as pl
from jax.experimental.pallas import tpu as pltpu

D_IN = 512
D_HID = 32
D_OUT = 1


def _round_up(n, m):
    return ((n + m - 1) // m) * m


def _choose_tile(B, bm):
    # Batch tile must be a multiple of 128 so the lane-dense (1, bm) output
    # block is unmasked (and trivially a multiple of 8 for x's sublane tiling).
    bm = _round_up(max(bm, 128), 128)
    # If the whole batch would fit in a single tile but is big enough to split,
    # use two grid steps so both TensorCores get work (v7x megacore).
    if B > 128 and B <= bm:
        bm = _round_up(pl.cdiv(B, 2), 128)
    # Never larger than the (128-rounded) batch.
    return min(bm, _round_up(B, 128))


def _mlp_kernel(x_ref, w1_ref, b1_ref, w2t_ref, b2_ref, o_ref):
    # x_ref:  (bm, 512) f32   w1_ref: (512, 32) f32   b1_ref: (1, 32) f32
    # w2t_ref:(1, 32)   f32   b2_ref: (1, 1)   f32    o_ref:  (1, bm) f32
    h = jnp.dot(x_ref[...], w1_ref[...], preferred_element_type=jnp.float32)
    h = jnp.maximum(h + b1_ref[...], 0.0)                      # (bm, 32)
    # Second layer: contract the hidden dim of both operands so the result is
    # already lane-dense (batch on lanes): (1, 32) . (bm, 32)^T -> (1, bm).
    o = lax.dot_general(
        w2t_ref[...], h,
        dimension_numbers=(((1,), (1,)), ((), ())),
        preferred_element_type=jnp.float32,
    )
    o_ref[...] = (o + b2_ref[...]).astype(o_ref.dtype)


def outlier_mlp(x, w1, b1, w2, b2, *, bm=2048):
    """x: (B, 512) f32. w1: (512, 32), b1: (32,), w2: (32, 1), b2: (1,).

    Returns (B, 1) float32, equivalent to Linear(512,32) -> ReLU -> Linear(32,1)
    with weights stored as (in_features, out_features).
    """
    B, d_in = x.shape
    assert d_in == D_IN

    bm_eff = _choose_tile(B, bm)
    num_tiles = pl.cdiv(B, bm_eff)
    n_pad = num_tiles * bm_eff

    # Tiny parameter tensors only; x is passed through untouched (no extra
    # HBM pass for casting/padding).
    w1_f = w1.astype(jnp.float32)
    b1_2d = b1.reshape(1, D_HID).astype(jnp.float32)
    w2_t = w2.astype(jnp.float32).reshape(1, D_HID)   # (32, 1) -> (1, 32)
    b2_2d = b2.reshape(1, D_OUT).astype(jnp.float32)

    out = pl.pallas_call(
        _mlp_kernel,
        out_shape=jax.ShapeDtypeStruct((1, n_pad), jnp.float32),
        grid_spec=pltpu.PrefetchScalarGridSpec(
            num_scalar_prefetch=0,
            grid=(num_tiles,),
            in_specs=[
                # x tile (streamed); last block may be partially OOB -> garbage
                # tail rows, dropped by the wrapper slice below.
                pl.BlockSpec((bm_eff, D_IN), lambda i: (i, 0)),
                # Constant index_maps: weights/biases stay resident in VMEM.
                pl.BlockSpec((D_IN, D_HID), lambda i: (0, 0)),    # W1
                pl.BlockSpec((1, D_HID), lambda i: (0, 0)),       # b1
                pl.BlockSpec((1, D_HID), lambda i: (0, 0)),       # W2^T
                pl.BlockSpec((1, D_OUT), lambda i: (0, 0)),       # b2
            ],
            # Lane-dense output: one (1, bm) slab per grid step, contiguous
            # unmasked stores / writeback DMA.
            out_specs=pl.BlockSpec((1, bm_eff), lambda i: (0, i)),
        ),
        compiler_params=pltpu.CompilerParams(
            dimension_semantics=("parallel",),
        ),
    )(x, w1_f, b1_2d, w2_t, b2_2d)

    # (1, n_pad) lane-major row -> (B, 1); padded tail rows are discarded.
    return out[0, :B].reshape(B, D_OUT)


if __name__ == "__main__":
    key = jax.random.PRNGKey(0)
    k_x, k_w1, k_b1, k_w2, k_b2 = jax.random.split(key, 5)

    # B=300 is deliberately ragged: the tile chooser picks bm=256, giving a
    # 2-step grid whose last x block is partially out-of-bounds, exercising the
    # no-pad path and the lane-dense output writeback.
    B = 300
    x = jax.random.normal(k_x, (B, D_IN), dtype=jnp.float32)
    w1 = jax.random.normal(k_w1, (D_IN, D_HID), dtype=jnp.float32) * 0.02
    b1 = jax.random.normal(k_b1, (D_HID,), dtype=jnp.float32) * 0.01
    w2 = jax.random.normal(k_w2, (D_HID, D_OUT), dtype=jnp.float32) * 0.02
    b2 = jax.random.normal(k_b2, (D_OUT,), dtype=jnp.float32) * 0.01

    out = jax.block_until_ready(outlier_mlp(x, w1, b1, w2, b2))

    # Pure-JAX f32 reference.
    ref = jnp.maximum(x @ w1 + b1, 0.0) @ w2 + b2
    assert out.shape == (B, D_OUT)
    assert jnp.allclose(out, ref, atol=1e-2, rtol=1e-2), float(jnp.abs(out - ref).max())

    print("KERNEL_OK")
</pallas_src>

<mosaic_0001>
module attributes {stable_mosaic.version = 11 : i64} {
  func.func @_mlp_kernel(%arg0: i32, %arg1: memref<256x512xf32, #tpu.memory_space<vmem>>, %arg2: memref<512x32xf32, #tpu.memory_space<vmem>>, %arg3: memref<1x32xf32, #tpu.memory_space<vmem>>, %arg4: memref<1x32xf32, #tpu.memory_space<vmem>>, %arg5: memref<1x1xf32, #tpu.memory_space<vmem>>, %arg6: memref<1x256xf32, #tpu.memory_space<vmem>>) attributes {dimension_semantics = [#tpu.dimension_semantics<parallel>], iteration_bounds = array<i64: 2>, scalar_prefetch = 0 : i64, scratch_operands = 0 : i64, tpu.core_type = #tpu.core_type<tc>, window_params = [{transform_indices = @transform_0, window_bounds = array<i64: 256, 512>}, {pipeline_mode = #tpu.pipeline_mode<synchronous>, transform_indices = @transform_1, window_bounds = array<i64: 512, 32>}, {pipeline_mode = #tpu.pipeline_mode<synchronous>, transform_indices = @transform_2, window_bounds = array<i64: 1, 32>}, {pipeline_mode = #tpu.pipeline_mode<synchronous>, transform_indices = @transform_3, window_bounds = array<i64: 1, 32>}, {pipeline_mode = #tpu.pipeline_mode<synchronous>, transform_indices = @transform_4, window_bounds = array<i64: 1, 1>}, {transform_indices = @transform_5, window_bounds = array<i64: 1, 256>}]} {
    %c0 = arith.constant 0 : index
    %c0_0 = arith.constant 0 : index
    %0 = vector.load %arg1[%c0, %c0_0] : memref<256x512xf32, #tpu.memory_space<vmem>>, vector<256x512xf32>
    %c0_1 = arith.constant 0 : index
    %c0_2 = arith.constant 0 : index
    %1 = vector.load %arg2[%c0_1, %c0_2] : memref<512x32xf32, #tpu.memory_space<vmem>>, vector<512x32xf32>
    %cst = arith.constant dense<0.000000e+00> : vector<256x32xf32>
    %2 = tpu.matmul %0, %1, %cst {dimension_numbers = #tpu.dot_dimension_numbers<[1], [0], [0], [1], [0, 0, 1, 1], [], []>} : vector<256x512xf32>, vector<512x32xf32>, vector<256x32xf32> -> vector<256x32xf32>
    %c0_3 = arith.constant 0 : index
    %c0_4 = arith.constant 0 : index
    %3 = vector.load %arg3[%c0_3, %c0_4] : memref<1x32xf32, #tpu.memory_space<vmem>>, vector<1x32xf32>
    %4 = vector.broadcast %3 : vector<1x32xf32> to vector<256x32xf32>
    %5 = arith.addf %2, %4 : vector<256x32xf32>
    %cst_5 = arith.constant 0.000000e+00 : f32
    %6 = vector.broadcast %cst_5 : f32 to vector<256x32xf32>
    %7 = arith.maximumf %5, %6 : vector<256x32xf32>
    %c0_6 = arith.constant 0 : index
    %c0_7 = arith.constant 0 : index
    %8 = vector.load %arg4[%c0_6, %c0_7] : memref<1x32xf32, #tpu.memory_space<vmem>>, vector<1x32xf32>
    %cst_8 = arith.constant dense<0.000000e+00> : vector<1x256xf32>
    %9 = tpu.matmul %8, %7, %cst_8 {dimension_numbers = #tpu.dot_dimension_numbers<[1], [1], [0], [0], [0, 0, 1, 0], [], []>} : vector<1x32xf32>, vector<256x32xf32>, vector<1x256xf32> -> vector<1x256xf32>
    %c0_9 = arith.constant 0 : index
    %c0_10 = arith.constant 0 : index
    %10 = vector.load %arg5[%c0_9, %c0_10] : memref<1x1xf32, #tpu.memory_space<vmem>>, vector<1x1xf32>
    %11 = vector.broadcast %10 : vector<1x1xf32> to vector<1x256xf32>
    %12 = arith.addf %9, %11 : vector<1x256xf32>
    %c0_11 = arith.constant 0 : index
    %c0_12 = arith.constant 0 : index
    %13 = vector.load %arg6[%c0_11, %c0_12] : memref<1x256xf32, #tpu.memory_space<vmem>>, vector<1x256xf32>
    tpu.vector_store %arg6[%c0_11, %c0_12], %12 {strides = array<i32>} : memref<1x256xf32, #tpu.memory_space<vmem>>, vector<1x256xf32>,
    return
  }
  func.func @transform_0(%arg0: i32) -> (i32, i32) {
    %c0_i32 = arith.constant 0 : i32
    %c0_i32_0 = arith.constant 0 : i32
    return %arg0, %c0_i32 : i32, i32
  }
  func.func @transform_1(%arg0: i32) -> (i32, i32) {
    %c0_i32 = arith.constant 0 : i32
    %c0_i32_0 = arith.constant 0 : i32
    %c0_i32_1 = arith.constant 0 : i32
    return %c0_i32, %c0_i32_0 : i32, i32
  }
  func.func @transform_2(%arg0: i32) -> (i32, i32) {
    %c0_i32 = arith.constant 0 : i32
    %c0_i32_0 = arith.constant 0 : i32
    %c0_i32_1 = arith.constant 0 : i32
    return %c0_i32, %c0_i32_0 : i32, i32
  }
  func.func @transform_3(%arg0: i32) -> (i32, i32) {
    %c0_i32 = arith.constant 0 : i32
    %c0_i32_0 = arith.constant 0 : i32
    %c0_i32_1 = arith.constant 0 : i32
    return %c0_i32, %c0_i32_0 : i32, i32
  }
  func.func @transform_4(%arg0: i32) -> (i32, i32) {
    %c0_i32 = arith.constant 0 : i32
    %c0_i32_0 = arith.constant 0 : i32
    %c0_i32_1 = arith.constant 0 : i32
    return %c0_i32, %c0_i32_0 : i32, i32
  }
  func.func @transform_5(%arg0: i32) -> (i32, i32) {
    %c0_i32 = arith.constant 0 : i32
    %c0_i32_0 = arith.constant 0 : i32
    return %c0_i32, %arg0 : i32, i32
  }
}

</mosaic_0001>

<bundles_post_ra>
// kernel: tpu_custom_call.1
= control target key start
LH: loop header
LB: loop body
LE: loop exit
PB: predicated region body
PF: predicated region fallthrough
CT: control target
= control target key end

     0   :  { %s2189_s0 = inlined_call_operand.hbm [shape: f32[300,512], index: 0, kind: input, shape index: {}]   ;;  %s2190_s1 = inlined_call_operand.vmem [shape: f32[512,32], index: 1, kind: input, shape index: {}]   ;;  %s2191_s2 = inlined_call_operand.vmem [shape: f32[1,32], index: 2, kind: input, shape index: {}]   ;;  %s2192_s3 = inlined_call_operand.vmem [shape: f32[1,32], index: 3, kind: input, shape index: {}]   ;;  %s2193_s4 = inlined_call_operand.<no memory space> [shape: f32[1,1], index: 4, kind: input, shape index: {}]   ;;  %s2194_s5 = inlined_call_operand.hbm [shape: f32[1,512], index: 5, kind: output, shape index: {}]  }
   0x1   :  { %v10_v0 = vstv %s2193_s4 }
   0x2   :  { %11 = vst [vmem:[#allocation2] sm:$0x1] %v10_v0 }
   0x3   :  { %12 = vsyncpa [#allocation4], 0 }
   0x4   :  { %14 = vsyncpa [#allocation4 + $0x1], 0 }
   0x5   :  { %15 = vsyncpa [#allocation5], 0 }
   0x6   :  { %17 = vsyncpa [#allocation5 + $0x1], 0  ;;  %s1501_s20 = smov 0   ;;  %s1503_s21 = smov 0  }
   0x7   :  { %s1505_s22 = smov 0   ;;  %s1507_s23 = smov 0  }
   0x8 LB: > { %s1522_s4 = sadd.s32 4294967295, %s1459_s23   ;;  %s1231_s24 = sadd.s32 4294967294, %s1459_s23   ;;  %s1459_s23 = sphi %s1507_s23, %s2204_s23   ;;  %s1455_s22 = sphi %s1505_s22, %s2203_s22   ;;  %s1451_s21 = sphi %s1503_s21, %s2202_s21   ;;  %s1447_s20 = sphi %s1501_s20, %s2201_s20  }
   0x9   : > { %s1526_s25 = sadd.s32 1, %s1459_s23   ;;  %s30_s26 = sadd.s32 1, %s1455_s22 }
   0xa   : > { %s27_s27 = ssub.s32 %s1459_s23, %s1526_s25  ;;  %p37_p0 = scmp.ne.s32.totalorder %s1455_s22, %s1451_s21 }
   0xb   : > { %p28_p1 = scmp.eq.s32.totalorder %s27_s27, 0  ;;  %p38_p2 = scmp.eq.s32.totalorder %s1459_s23, 0 }
   0xc   : > { %p43_p3 = scmp.ne.s32.totalorder %s1451_s21, %s1447_s20  ;;  %p44_p4 = scmp.eq.s32.totalorder %s1522_s4, 0 }
   0xd   : > { %s1538_s28 = scalar_select %p28_p1, %s1455_s22, %s30_s26  }
   0xe   : > { %p39_p5 = por %p38_p2, %p37_p0  ;;  %p1540_p6 = por %p44_p4, %p43_p3 }
   0xf   : > { %p151_p7 = scmp.eq.s32.totalorder %s1522_s4, 1  ;;  %p157_p8 = scmp.eq.s32.totalorder %s1231_s24, 1 }
  0x10   : > { %p2195_p11 = scmp.ge.s32.totalorder %s1459_s23, 2 }
  0x11   : > { %p1545_p9 = por %p151_p7, %p37_p0  ;;  %p1549_p10 = por %p157_p8, %p43_p3 }
  0x12   : > { %185 = sbr.rel (%p2195_p11) target bundleno = 55 (0x37), region = 32 }
  0x13   : > { %s2198_s6 = scalar_select %p1549_p10, 1, 0 }
  0x17   : > { %188 = sbr.rel (!%p39_p5) target bundleno = 55 (0x37), region = 36  ;;  %s189_s7 = sand.u32 (%p39_p5), 1, %s1455_s22  }
  0x18   : > { %s1235_s8 = sshll.u32 (%p39_p5), %s1459_s23, 5  ;;  %s1234_s9 = sshll.u32 (%p39_p5), %s189_s7, 10 }
  0x19   : > { %s195_s10 = ssub.s32 (%p39_p5), 38, %s1235_s8  ;;  %s1561_s13 = scalar_lea.sflag (%p39_p5), [#allocation4], %s189_s7 }
  0x1a   : > { %p196_p12 = scmp.lt.s32.totalorder (%p39_p5), %s195_s10, 32  ;;  %s193_s14 = scalar_lea.vmem (%p39_p5), [#allocation3], %s1234_s9 }
  0x1c   : > { %s2206_s10 = smov (!%p196_p12, %s195_s10), 32 }
  0x1d   : > { %s1558_s11 = sshll.u32 %s2206_s10, 9 }
  0x1e   : > { %s201_s12 = ssub.s32 16384, %s1558_s11 }
  0x1f   : > { %202 = vsyncadd %s1561_s13, %s201_s12  ;;  %p1238_p13 = scmp.ne.s32.totalorder %s1558_s11, 0  ;;  %s1287_s15 = sshll.u32 %s1459_s23, 14 }
  0x20   : > { %s1569_s18 = scalar_lea.hbm %s2189_s0, %s1287_s15  ;;  %s208_s19 = sshll.u32 %s193_s14, 4  ;;  %s1571_s19 = int_to_ptr.vmem [resolvable:$true] %s208_s19 }
  0x21   : > { %s1369_s24 = scalar_lea.hbm %s1569_s18, %s1558_s11  ;;  %s1373_s7 = scalar_lea.hbm %s2189_s0, 19456 }
  0x22   : > { %p1370_p0 = scmp.ne.s32.totalorder %s1569_s18, %s1369_s24  ;;  %p1374_p3 = scmp.lt.s32.totalorder %s1569_s18, %s2189_s0 }
  0x23   : > { %p1375_p4 = scmp.lt.s32.totalorder %s1373_s7, %s1369_s24 }
  0x24   : > { %p1371_p1 = pnand %p1370_p0, %p1238_p13 }
  0x25   : > { %p1376_p5 = por %p1375_p4, %p1374_p3 }
  0x26   : > { %p1372_p2 = pneg %p1371_p1 }
  0x28   : > { %p1377_p7 = pnand %p1376_p5, %p1372_p2 }
  0x2a   : > { %1380 = shalt.err (!%p1377_p7)
}
  0x2b   : > { %s1381_s10 = scalar_lea.vmem %s1571_s19, %s1558_s11  ;;  %s1461_s12 = smov [#allocation3]  }
  0x2c   : > { %p1382_p8 = scmp.ne.s32.totalorder %s1571_s19, %s1381_s10  ;;  %s1385_s14 = sshll.u32 %s1461_s12, 4  ;;  %s1386_s14 = int_to_ptr.vmem [resolvable:$false] %s1385_s14 }
  0x2d   : > { %s1387_s15 = scalar_lea.vmem %s1386_s14, 32768  ;;  %p1388_p1 = scmp.lt.s32.totalorder %s1571_s19, %s1386_s14 }
  0x2e   : > { %p1383_p12 = pnand %p1382_p8, %p1238_p13  ;;  %p1389_p11 = scmp.lt.s32.totalorder %s1387_s15, %s1381_s10 }
  0x30   : > { %p1384_p0 = pneg %p1383_p12  ;;  %p1390_p10 = por %p1389_p11, %p1388_p1 }
  0x32   : > { %p1391_p3 = pnand %p1390_p10, %p1384_p0 }
  0x34   : > { %1394 = shalt.err (!%p1391_p3)
}
  0x35   : > { %s1462_s16 = smov 512   ;;  %s1463_s17 = smov 32  }
  0x36   : > { %214 = dma.hbm_to_vmem [thread:$0]  (%p1238_p13), %s1569_s18, %s1558_s11, %s1571_s19, %s1561_s13, %s1462_s16, %s1462_s16, %s1463_s17  }
  0x37 PF: > { %p1243_p2 = scmp.ge.s32.totalorder %s1459_s23, 1  ;;  %p216_p4 = scmp.lt.s32.totalorder %s1459_s23, 3 }
  0x39   : > { %p217_p5 = pnand %p1243_p2, %p216_p4 }
  0x3a   : > { %s1600_s24 = sand.u32 (!%p217_p5), 1, %s1451_s21  }
  0x3b   : > { %220 = sbr.rel (%p217_p5) target bundleno = 734 (0x2de), region = 40  ;;  %s1244_s26 = sshll.u32 (!%p217_p5), %s1600_s24, 10 }
  0x3c   : > { %s223_s27 = scalar_lea.sflag (!%p217_p5), [#allocation4], %s1600_s24  ;;  %s1604_s7 = scalar_lea.vmem (!%p217_p5), [#allocation3], %s1244_s26 }
  0x40   : > { %1438 = dma.done.wait (%p1540_p6), %s223_s27, 16384  }
  0x41   : > { %1440 = vsyncadd (%p1540_p6), %s223_s27, 4294950912  ;;  %v1464_v1 = vmov 0.0   ;;  %v403_v2 = vld [vmem:[%s2190_s1 + $0x78] sm:$0xff]  ;;  %v402_v4 = vld [vmem:[%s2190_s1 + $0x70] sm:$0xff]  ;;  %vm952_vm0 = vcmask 261120   ;;  %s1245_s16 = sshll.u32 %s1600_s24, 1 }
  0x42   : > { %459 = vmatprep.subr.mxu0 %v1464_v1  ;;  %684 = vmatprep.subr.mxu1 %v1464_v1  ;;  %v435_v3 = vld [vmem:[%s2190_s1 + $0x178] sm:$0xff]  ;;  %v434_v5 = vld [vmem:[%s2190_s1 + $0x170] sm:$0xff]  ;;  %v401_v6 = vld [vmem:[%s2190_s1 + $0x68] sm:$0xff]  ;;  %s1288_s17 = sshll.u32 %s1522_s4, 5  ;;  %s252_s26 = scalar_lea.vmem [#allocation6], %s1245_s16 }
  0x43   : > { %460 = vmatpush1.msra.mxu0 %v403_v2  ;;  %685 = vmatpush1.msra.mxu1 %v435_v3  ;;  %v433_v7 = vld [vmem:[%s2190_s1 + $0x168] sm:$0xff]  ;;  %v400_v8 = vld [vmem:[%s2190_s1 + $0x60] sm:$0xff]  ;;  %v399_v10 = vld [vmem:[%s2190_s1 + $0x58] sm:$0xff]  ;;  %s1161_s27 = sshll.u32 %s252_s26, 4  ;;  %s1159_s18 = scalar_lea.hbm %s2194_s5, %s1288_s17  ;;  %s1162_s27 = int_to_ptr.vmem [resolvable:$true] %s1161_s27 }
  0x44   : > { %461 = vmatprep.subr.mxu0 %v1464_v1  ;;  %686 = vmatprep.subr.mxu1 %v1464_v1  ;;  %v432_v9 = vld [vmem:[%s2190_s1 + $0x160] sm:$0xff]  ;;  %v431_v11 = vld [vmem:[%s2190_s1 + $0x158] sm:$0xff]  ;;  %v398_v12 = vld [vmem:[%s2190_s1 + $0x50] sm:$0xff]  ;;  %s1147_s19 = scalar_lea.sflag [#allocation5], %s1600_s24  ;;  %s1395_s8 = scalar_lea.vmem %s1162_s27, 32 }
  0x45   : > { %462 = vmatpush1.msra.mxu0 %v402_v4  ;;  %687 = vmatpush1.msra.mxu1 %v434_v5  ;;  %v430_v13 = vld [vmem:[%s2190_s1 + $0x150] sm:$0xff]  ;;  %v397_v14 = vld [vmem:[%s2190_s1 + $0x48] sm:$0xff]  ;;  %v396_v16 = vld [vmem:[%s2190_s1 + $0x40] sm:$0xff]  ;;  %p1396_p6 = scmp.ne.s32.totalorder %s1162_s27, %s1395_s8  ;;  %s1467_s9 = smov [#allocation6]  }
  0x46   : > { %463 = vmatprep.subr.mxu0 %v1464_v1  ;;  %688 = vmatprep.subr.mxu1 %v1464_v1  ;;  %v429_v15 = vld [vmem:[%s2190_s1 + $0x148] sm:$0xff]  ;;  %v428_v17 = vld [vmem:[%s2190_s1 + $0x140] sm:$0xff]  ;;  %v395_v18 = vld [vmem:[%s2190_s1 + $0x38] sm:$0xff]  ;;  %s1399_s29 = sshll.u32 %s1467_s9, 4  ;;  %s1400_s29 = int_to_ptr.vmem [resolvable:$false] %s1399_s29 }
  0x47   : > { %464 = vmatpush1.msra.mxu0 %v401_v6  ;;  %689 = vmatpush1.msra.mxu1 %v433_v7  ;;  %v427_v19 = vld [vmem:[%s2190_s1 + $0x138] sm:$0xff]  ;;  %v394_v20 = vld [vmem:[%s2190_s1 + $0x30] sm:$0xff]  ;;  %v393_v22 = vld [vmem:[%s2190_s1 + $0x28] sm:$0xff]  ;;  %p1397_p10 = pnand %p1396_p6, %p1545_p9  ;;  %s1401_s4 = scalar_lea.vmem %s1400_s29, 64 }
  0x48   : > { %465 = vmatprep.subr.mxu0 %v1464_v1  ;;  %690 = vmatprep.subr.mxu1 %v1464_v1  ;;  %v426_v21 = vld [vmem:[%s2190_s1 + $0x130] sm:$0xff]  ;;  %v425_v23 = vld [vmem:[%s2190_s1 + $0x128] sm:$0xff]  ;;  %v392_v24 = vld [vmem:[%s2190_s1 + $0x20] sm:$0xff]  ;;  %p1402_p13 = scmp.lt.s32.totalorder %s1162_s27, %s1400_s29  ;;  %p1403_p7 = scmp.lt.s32.totalorder %s1401_s4, %s1395_s8 }
  0x49   : > { %466 = vmatpush1.msra.mxu0 %v400_v8  ;;  %691 = vmatpush1.msra.mxu1 %v432_v9  ;;  %v424_v25 = vld [vmem:[%s2190_s1 + $0x120] sm:$0xff]  ;;  %v391_v26 = vld [vmem:[%s2190_s1 + $0x18] sm:$0xff]  ;;  %v390_v28 = vld [vmem:[%s2190_s1 + $0x10] sm:$0xff]  ;;  %p1398_p11 = pneg %p1397_p10 }
  0x4a   : > { %467 = vmatprep.subr.mxu0 %v1464_v1  ;;  %692 = vmatprep.subr.mxu1 %v1464_v1  ;;  %v423_v27 = vld [vmem:[%s2190_s1 + $0x118] sm:$0xff]  ;;  %v422_v29 = vld [vmem:[%s2190_s1 + $0x110] sm:$0xff]  ;;  %v389_v30 = vld [vmem:[%s2190_s1 + $0x8] sm:$0xff]  ;;  %p1404_p8 = por %p1403_p7, %p1402_p13 }
  0x4b   : > { %468 = vmatpush1.msra.mxu0 %v399_v10  ;;  %693 = vmatpush1.msra.mxu1 %v431_v11  ;;  %v421_v31 = vld [vmem:[%s2190_s1 + $0x108] sm:$0xff]  ;;  %v388_v32 = vld [vmem:[%s2190_s1] sm:$0xff]  ;;  %v419_v34 = vld [vmem:[%s2190_s1 + $0xf8] sm:$0xff] }
  0x4c   : > { %469 = vmatprep.subr.mxu0 %v1464_v1  ;;  %694 = vmatprep.subr.mxu1 %v1464_v1  ;;  %v420_v33 = vld [vmem:[%s2190_s1 + $0x100] sm:$0xff]  ;;  %v451_v35 = vld [vmem:[%s2190_s1 + $0x1f8] sm:$0xff]  ;;  %v418_v36 = vld [vmem:[%s2190_s1 + $0xf0] sm:$0xff]  ;;  %p1405_p12 = pnand %p1404_p8, %p1398_p11 }
  0x4d   : > { %470 = vmatpush1.msra.mxu0 %v398_v12  ;;  %695 = vmatpush1.msra.mxu1 %v430_v13  ;;  %v450_v37 = vld [vmem:[%s2190_s1 + $0x1f0] sm:$0xff]  ;;  %v417_v38 = vld [vmem:[%s2190_s1 + $0xe8] sm:$0xff]  ;;  %v416_v40 = vld [vmem:[%s2190_s1 + $0xe0] sm:$0xff] }
  0x4e   : > { %471 = vmatprep.subr.mxu0 %v1464_v1  ;;  %696 = vmatprep.subr.mxu1 %v1464_v1  ;;  %v449_v39 = vld [vmem:[%s2190_s1 + $0x1e8] sm:$0xff]  ;;  %v448_v41 = vld [vmem:[%s2190_s1 + $0x1e0] sm:$0xff]  ;;  %v415_v42 = vld [vmem:[%s2190_s1 + $0xd8] sm:$0xff] }
  0x4f   : > { %472 = vmatpush1.msra.mxu0 %v397_v14  ;;  %697 = vmatpush1.msra.mxu1 %v429_v15  ;;  %v447_v43 = vld [vmem:[%s2190_s1 + $0x1d8] sm:$0xff]  ;;  %v414_v44 = vld [vmem:[%s2190_s1 + $0xd0] sm:$0xff]  ;;  %v413_v46 = vld [vmem:[%s2190_s1 + $0xc8] sm:$0xff] }
  0x50   : > { %473 = vmatprep.subr.mxu0 %v1464_v1  ;;  %698 = vmatprep.subr.mxu1 %v1464_v1  ;;  %v446_v45 = vld [vmem:[%s2190_s1 + $0x1d0] sm:$0xff]  ;;  %v445_v47 = vld [vmem:[%s2190_s1 + $0x1c8] sm:$0xff]  ;;  %v412_v48 = vld [vmem:[%s2190_s1 + $0xc0] sm:$0xff] }
  0x51   : > { %474 = vmatpush1.msra.mxu0 %v396_v16  ;;  %699 = vmatpush1.msra.mxu1 %v428_v17  ;;  %v444_v49 = vld [vmem:[%s2190_s1 + $0x1c0] sm:$0xff]  ;;  %v411_v50 = vld [vmem:[%s2190_s1 + $0xb8] sm:$0xff]  ;;  %v410_v52 = vld [vmem:[%s2190_s1 + $0xb0] sm:$0xff] }
  0x52   : > { %475 = vmatprep.subr.mxu0 %v1464_v1  ;;  %700 = vmatprep.subr.mxu1 %v1464_v1  ;;  %v443_v51 = vld [vmem:[%s2190_s1 + $0x1b8] sm:$0xff]  ;;  %v442_v53 = vld [vmem:[%s2190_s1 + $0x1b0] sm:$0xff]  ;;  %v409_v54 = vld [vmem:[%s2190_s1 + $0xa8] sm:$0xff] }
  0x53   : > { %476 = vmatpush1.msra.mxu0 %v395_v18  ;;  %701 = vmatpush1.msra.mxu1 %v427_v19  ;;  %v441_v55 = vld [vmem:[%s2190_s1 + $0x1a8] sm:$0xff]  ;;  %v408_v56 = vld [vmem:[%s2190_s1 + $0xa0] sm:$0xff]  ;;  %v407_v58 = vld [vmem:[%s2190_s1 + $0x98] sm:$0xff] }
  0x54   : > { %477 = vmatprep.subr.mxu0 %v1464_v1  ;;  %702 = vmatprep.subr.mxu1 %v1464_v1  ;;  %v440_v57 = vld [vmem:[%s2190_s1 + $0x1a0] sm:$0xff]  ;;  %v439_v59 = vld [vmem:[%s2190_s1 + $0x198] sm:$0xff]  ;;  %v406_v60 = vld [vmem:[%s2190_s1 + $0x90] sm:$0xff] }
  0x55   : > { %478 = vmatpush1.msra.mxu0 %v394_v20  ;;  %703 = vmatpush1.msra.mxu1 %v426_v21  ;;  %v438_v61 = vld [vmem:[%s2190_s1 + $0x190] sm:$0xff]  ;;  %v405_v62 = vld [vmem:[%s2190_s1 + $0x88] sm:$0xff]  ;;  %v404_v0 = vld [vmem:[%s2190_s1 + $0x80] sm:$0xff] }
  0x56   : > { %479 = vmatprep.subr.mxu0 %v1464_v1  ;;  %704 = vmatprep.subr.mxu1 %v1464_v1  ;;  %v437_v63 = vld [vmem:[%s2190_s1 + $0x188] sm:$0xff]  ;;  %v436_v3 = vld [vmem:[%s2190_s1 + $0x180] sm:$0xff]  ;;  %v262_v6 = vld [vmem:[%s1604_s7 + $0x10] sm:$0xff] }
  0x57   : > { %480 = vmatpush1.msra.mxu0 %v393_v22  ;;  %705 = vmatpush1.msra.mxu1 %v425_v23  ;;  %v261_v2 = vld [vmem:[%s1604_s7 + $0x8] sm:$0xff]  ;;  %v263_v4 = vld [vmem:[%s1604_s7 + $0x18] sm:$0xff]  ;;  %v260_v5 = vld [vmem:[%s1604_s7] sm:$0xff] }
  0x58   : > { %481 = vmatprep.subr.mxu0 %v1464_v1  ;;  %706 = vmatprep.subr.mxu1 %v1464_v1  ;;  %v265_v7 = vld [vmem:[%s1604_s7 + $0x28] sm:$0xff]  ;;  %v267_v8 = vld [vmem:[%s1604_s7 + $0x38] sm:$0xff]  ;;  %v264_v9 = vld [vmem:[%s1604_s7 + $0x20] sm:$0xff] }
  0x59   : > { %482 = vmatpush1.msra.mxu0 %v392_v24  ;;  %707 = vmatpush1.msra.mxu1 %v424_v25  ;;  %v269_v10 = vld [vmem:[%s1604_s7 + $0x48] sm:$0xff]  ;;  %v271_v11 = vld [vmem:[%s1604_s7 + $0x58] sm:$0xff]  ;;  %v268_v12 = vld [vmem:[%s1604_s7 + $0x40] sm:$0xff] }
  0x5a   : > { %483 = vmatprep.subr.mxu0 %v1464_v1  ;;  %708 = vmatprep.subr.mxu1 %v1464_v1  ;;  %v270_v13 = vld [vmem:[%s1604_s7 + $0x50] sm:$0xff]  ;;  %v273_v14 = vld [vmem:[%s1604_s7 + $0x68] sm:$0xff]  ;;  %v275_v15 = vld [vmem:[%s1604_s7 + $0x78] sm:$0xff] }
  0x5b   : > { %484 = vmatpush1.msra.mxu0 %v391_v26  ;;  %709 = vmatpush1.msra.mxu1 %v423_v27  ;;  %v272_v16 = vld [vmem:[%s1604_s7 + $0x60] sm:$0xff]  ;;  %v274_v17 = vld [vmem:[%s1604_s7 + $0x70] sm:$0xff]  ;;  %v277_v18 = vld [vmem:[%s1604_s7 + $0x88] sm:$0xff] }
  0x5c   : > { %485 = vmatprep.subr.mxu0 %v1464_v1  ;;  %710 = vmatprep.subr.mxu1 %v1464_v1  ;;  %v279_v19 = vld [vmem:[%s1604_s7 + $0x98] sm:$0xff]  ;;  %v276_v20 = vld [vmem:[%s1604_s7 + $0x80] sm:$0xff]  ;;  %v278_v21 = vld [vmem:[%s1604_s7 + $0x90] sm:$0xff] }
  0x5d   : > { %486 = vmatpush1.msra.mxu0 %v390_v28  ;;  %711 = vmatpush1.msra.mxu1 %v422_v29  ;;  %v281_v22 = vld [vmem:[%s1604_s7 + $0xa8] sm:$0xff]  ;;  %v283_v23 = vld [vmem:[%s1604_s7 + $0xb8] sm:$0xff]  ;;  %v280_v24 = vld [vmem:[%s1604_s7 + $0xa0] sm:$0xff] }
  0x5e   : > { %487 = vmatprep.subr.mxu0 %v1464_v1  ;;  %712 = vmatprep.subr.mxu1 %v1464_v1  ;;  %v282_v25 = vld [vmem:[%s1604_s7 + $0xb0] sm:$0xff]  ;;  %v285_v26 = vld [vmem:[%s1604_s7 + $0xc8] sm:$0xff]  ;;  %v287_v27 = vld [vmem:[%s1604_s7 + $0xd8] sm:$0xff] }
  0x5f   : > { %488 = vmatpush1.msra.mxu0 %v389_v30  ;;  %713 = vmatpush1.msra.mxu1 %v421_v31  ;;  %v284_v28 = vld [vmem:[%s1604_s7 + $0xc0] sm:$0xff]  ;;  %v286_v29 = vld [vmem:[%s1604_s7 + $0xd0] sm:$0xff]  ;;  %v289_v30 = vld [vmem:[%s1604_s7 + $0xe8] sm:$0xff] }
  0x60   : > { %489 = vmatprep.subr.mxu0 %v1464_v1  ;;  %714 = vmatprep.subr.mxu1 %v1464_v1  ;;  %v291_v31 = vld [vmem:[%s1604_s7 + $0xf8] sm:$0xff] }
  0x61   : > { %490 = vmatpush1.msra.mxu0 %v388_v32  ;;  %715 = vmatpush1.msra.mxu1 %v420_v33  ;;  %v288_v32 = vld [vmem:[%s1604_s7 + $0xe0] sm:$0xff]  ;;  %v290_v33 = vld [vmem:[%s1604_s7 + $0xf0] sm:$0xff] }
  0x62   : > { %491 = vmatprep.subr.mxu0 %v1464_v1  ;;  %716 = vmatprep.subr.mxu1 %v1464_v1 }
  0x63   : > { %492 = vmatpush2.msra.mxu0 %v419_v34  ;;  %717 = vmatpush2.msra.mxu1 %v451_v35  ;;  %v293_v34 = vld [vmem:[%s1604_s7 + $0x108] sm:$0xff]  ;;  %v295_v35 = vld [vmem:[%s1604_s7 + $0x118] sm:$0xff] }
  0x64   : > { %493 = vmatprep.subr.mxu0 %v1464_v1  ;;  %718 = vmatprep.subr.mxu1 %v1464_v1 }
  0x65   : > { %494 = vmatpush2.msra.mxu0 %v418_v36  ;;  %719 = vmatpush2.msra.mxu1 %v450_v37  ;;  %v292_v36 = vld [vmem:[%s1604_s7 + $0x100] sm:$0xff]  ;;  %v294_v37 = vld [vmem:[%s1604_s7 + $0x110] sm:$0xff] }
  0x66   : > { %495 = vmatprep.subr.mxu0 %v1464_v1  ;;  %720 = vmatprep.subr.mxu1 %v1464_v1 }
  0x67   : > { %496 = vmatpush2.msra.mxu0 %v417_v38  ;;  %721 = vmatpush2.msra.mxu1 %v449_v39  ;;  %v297_v38 = vld [vmem:[%s1604_s7 + $0x128] sm:$0xff]  ;;  %v299_v39 = vld [vmem:[%s1604_s7 + $0x138] sm:$0xff] }
  0x68   : > { %497 = vmatprep.subr.mxu0 %v1464_v1  ;;  %722 = vmatprep.subr.mxu1 %v1464_v1 }
  0x69   : > { %498 = vmatpush2.msra.mxu0 %v416_v40  ;;  %723 = vmatpush2.msra.mxu1 %v448_v41  ;;  %v296_v40 = vld [vmem:[%s1604_s7 + $0x120] sm:$0xff]  ;;  %v298_v41 = vld [vmem:[%s1604_s7 + $0x130] sm:$0xff] }
  0x6a   : > { %499 = vmatprep.subr.mxu0 %v1464_v1  ;;  %724 = vmatprep.subr.mxu1 %v1464_v1 }
  0x6b   : > { %500 = vmatpush2.msra.mxu0 %v415_v42  ;;  %725 = vmatpush2.msra.mxu1 %v447_v43  ;;  %v301_v42 = vld [vmem:[%s1604_s7 + $0x148] sm:$0xff]  ;;  %v303_v43 = vld [vmem:[%s1604_s7 + $0x158] sm:$0xff] }
  0x6c   : > { %501 = vmatprep.subr.mxu0 %v1464_v1  ;;  %726 = vmatprep.subr.mxu1 %v1464_v1 }
  0x6d   : > { %502 = vmatpush2.msra.mxu0 %v414_v44  ;;  %727 = vmatpush2.msra.mxu1 %v446_v45  ;;  %v300_v44 = vld [vmem:[%s1604_s7 + $0x140] sm:$0xff]  ;;  %v302_v45 = vld [vmem:[%s1604_s7 + $0x150] sm:$0xff] }
  0x6e   : > { %503 = vmatprep.subr.mxu0 %v1464_v1  ;;  %728 = vmatprep.subr.mxu1 %v1464_v1 }
  0x6f   : > { %504 = vmatpush2.msra.mxu0 %v413_v46  ;;  %729 = vmatpush2.msra.mxu1 %v445_v47  ;;  %v305_v46 = vld [vmem:[%s1604_s7 + $0x168] sm:$0xff]  ;;  %v307_v47 = vld [vmem:[%s1604_s7 + $0x178] sm:$0xff] }
  0x70   : > { %505 = vmatprep.subr.mxu0 %v1464_v1  ;;  %730 = vmatprep.subr.mxu1 %v1464_v1 }
  0x71   : > { %506 = vmatpush2.msra.mxu0 %v412_v48  ;;  %731 = vmatpush2.msra.mxu1 %v444_v49  ;;  %v304_v48 = vld [vmem:[%s1604_s7 + $0x160] sm:$0xff]  ;;  %v306_v49 = vld [vmem:[%s1604_s7 + $0x170] sm:$0xff] }
  0x72   : > { %507 = vmatprep.subr.mxu0 %v1464_v1  ;;  %732 = vmatprep.subr.mxu1 %v1464_v1 }
  0x73   : > { %508 = vmatpush2.msra.mxu0 %v411_v50  ;;  %733 = vmatpush2.msra.mxu1 %v443_v51  ;;  %v309_v50 = vld [vmem:[%s1604_s7 + $0x188] sm:$0xff]  ;;  %v311_v51 = vld [vmem:[%s1604_s7 + $0x198] sm:$0xff] }
  0x74   : > { %509 = vmatprep.subr.mxu0 %v1464_v1  ;;  %734 = vmatprep.subr.mxu1 %v1464_v1 }
  0x75   : > { %510 = vmatpush2.msra.mxu0 %v410_v52  ;;  %735 = vmatpush2.msra.mxu1 %v442_v53  ;;  %v308_v52 = vld [vmem:[%s1604_s7 + $0x180] sm:$0xff]  ;;  %v310_v53 = vld [vmem:[%s1604_s7 + $0x190] sm:$0xff] }
  0x76   : > { %511 = vmatprep.subr.mxu0 %v1464_v1  ;;  %736 = vmatprep.subr.mxu1 %v1464_v1 }
  0x77   : > { %512 = vmatpush2.msra.mxu0 %v409_v54  ;;  %737 = vmatpush2.msra.mxu1 %v441_v55  ;;  %v313_v54 = vld [vmem:[%s1604_s7 + $0x1a8] sm:$0xff]  ;;  %v315_v55 = vld [vmem:[%s1604_s7 + $0x1b8] sm:$0xff] }
  0x78   : > { %513 = vmatprep.subr.mxu0 %v1464_v1  ;;  %738 = vmatprep.subr.mxu1 %v1464_v1 }
  0x79   : > { %514 = vmatpush2.msra.mxu0 %v408_v56  ;;  %739 = vmatpush2.msra.mxu1 %v440_v57  ;;  %v312_v56 = vld [vmem:[%s1604_s7 + $0x1a0] sm:$0xff]  ;;  %v314_v57 = vld [vmem:[%s1604_s7 + $0x1b0] sm:$0xff] }
  0x7a   : > { %515 = vmatprep.subr.mxu0 %v1464_v1  ;;  %740 = vmatprep.subr.mxu1 %v1464_v1 }
  0x7b   : > { %516 = vmatpush2.msra.mxu0 %v407_v58  ;;  %741 = vmatpush2.msra.mxu1 %v439_v59  ;;  %v317_v58 = vld [vmem:[%s1604_s7 + $0x1c8] sm:$0xff]  ;;  %v319_v59 = vld [vmem:[%s1604_s7 + $0x1d8] sm:$0xff] }
  0x7c   : > { %517 = vmatprep.subr.mxu0 %v1464_v1  ;;  %742 = vmatprep.subr.mxu1 %v1464_v1 }
  0x7d   : > { %518 = vmatpush2.msra.mxu0 %v406_v60  ;;  %743 = vmatpush2.msra.mxu1 %v438_v61  ;;  %v316_v60 = vld [vmem:[%s1604_s7 + $0x1c0] sm:$0xff]  ;;  %v318_v61 = vld [vmem:[%s1604_s7 + $0x1d0] sm:$0xff] }
  0x7e   : > { %519 = vmatprep.subr.mxu0 %v1464_v1  ;;  %744 = vmatprep.subr.mxu1 %v1464_v1 }
  0x7f   : > { %520 = vmatpush2.msra.mxu0 %v405_v62  ;;  %745 = vmatpush2.msra.mxu1 %v437_v63  ;;  %v321_v62 = vld [vmem:[%s1604_s7 + $0x1e8] sm:$0xff]  ;;  %v323_v63 = vld [vmem:[%s1604_s7 + $0x1f8] sm:$0xff] }
  0x80   : > { %521 = vmatprep.subr.mxu0 %v1464_v1  ;;  %746 = vmatprep.subr.mxu1 %v1464_v1  ;;  %v266_v1 = vld [vmem:[%s1604_s7 + $0x30] sm:$0xff] }
  0x81   : > { %522 = vmatpush2.msra.mxu0 %v404_v0  ;;  %523 = vmatprep.mubr.f32.mxu0 %v261_v2  ;;  %v320_v0 = vld [vmem:[%s1604_s7 + $0x1e0] sm:$0xff]  ;;  %v322_v2 = vld [vmem:[%s1604_s7 + $0x1f0] sm:$0xff] }
  0x82   : > { %747 = vmatpush2.msra.mxu1 %v436_v3  ;;  %748 = vmatprep.mubr.f32.mxu1 %v263_v4  ;;  %v325_v3 = vld [vmem:[%s1604_s7 + $0x208] sm:$0xff]  ;;  %v327_v4 = vld [vmem:[%s1604_s7 + $0x218] sm:$0xff] }
  0x83   : > { %524 = vmatmul.mubr.f32.vlgmr.msra.gmra.mxu0 %v260_v5  ;;  %749 = vmatmul.mubr.f32.vlgmr.msra.gmra.mxu1 %v262_v6  ;;  %v324_v5 = vld [vmem:[%s1604_s7 + $0x200] sm:$0xff]  ;;  %v326_v6 = vld [vmem:[%s1604_s7 + $0x210] sm:$0xff] }
  0x84   : > { %528 = vmatprep.mubr.f32.mxu0 %v265_v7  ;;  %753 = vmatprep.mubr.f32.mxu1 %v267_v8  ;;  %v329_v7 = vld [vmem:[%s1604_s7 + $0x228] sm:$0xff]  ;;  %v331_v8 = vld [vmem:[%s1604_s7 + $0x238] sm:$0xff] }
  0x87   : > { %529 = vmatmul.mubr.f32.gmra.mxu0 %v264_v9  ;;  %754 = vmatmul.mubr.f32.gmra.mxu1 %v266_v1  ;;  %v328_v9 = vld [vmem:[%s1604_s7 + $0x220] sm:$0xff]  ;;  %v330_v1 = vld [vmem:[%s1604_s7 + $0x230] sm:$0xff] }
  0x88   : > { %533 = vmatprep.mubr.f32.mxu0 %v269_v10  ;;  %758 = vmatprep.mubr.f32.mxu1 %v271_v11  ;;  %v333_v10 = vld [vmem:[%s1604_s7 + $0x248] sm:$0xff]  ;;  %v335_v11 = vld [vmem:[%s1604_s7 + $0x258] sm:$0xff] }
  0x8b   : > { %534 = vmatmul.mubr.f32.gmra.mxu0 %v268_v12  ;;  %759 = vmatmul.mubr.f32.gmra.mxu1 %v270_v13  ;;  %v332_v12 = vld [vmem:[%s1604_s7 + $0x240] sm:$0xff]  ;;  %v334_v13 = vld [vmem:[%s1604_s7 + $0x250] sm:$0xff] }
  0x8c   : > { %538 = vmatprep.mubr.f32.mxu0 %v273_v14  ;;  %763 = vmatprep.mubr.f32.mxu1 %v275_v15  ;;  %v337_v14 = vld [vmem:[%s1604_s7 + $0x268] sm:$0xff]  ;;  %v339_v15 = vld [vmem:[%s1604_s7 + $0x278] sm:$0xff] }
  0x8f   : > { %539 = vmatmul.mubr.f32.gmra.mxu0 %v272_v16  ;;  %764 = vmatmul.mubr.f32.gmra.mxu1 %v274_v17  ;;  %v336_v16 = vld [vmem:[%s1604_s7 + $0x260] sm:$0xff]  ;;  %v338_v17 = vld [vmem:[%s1604_s7 + $0x270] sm:$0xff] }
  0x90   : > { %543 = vmatprep.mubr.f32.mxu0 %v277_v18  ;;  %768 = vmatprep.mubr.f32.mxu1 %v279_v19  ;;  %v341_v18 = vld [vmem:[%s1604_s7 + $0x288] sm:$0xff]  ;;  %v343_v19 = vld [vmem:[%s1604_s7 + $0x298] sm:$0xff] }
  0x93   : > { %544 = vmatmul.mubr.f32.gmra.mxu0 %v276_v20  ;;  %769 = vmatmul.mubr.f32.gmra.mxu1 %v278_v21  ;;  %v340_v20 = vld [vmem:[%s1604_s7 + $0x280] sm:$0xff]  ;;  %v342_v21 = vld [vmem:[%s1604_s7 + $0x290] sm:$0xff] }
  0x94   : > { %548 = vmatprep.mubr.f32.mxu0 %v281_v22  ;;  %773 = vmatprep.mubr.f32.mxu1 %v283_v23  ;;  %v345_v22 = vld [vmem:[%s1604_s7 + $0x2a8] sm:$0xff]  ;;  %v347_v23 = vld [vmem:[%s1604_s7 + $0x2b8] sm:$0xff] }
  0x97   : > { %549 = vmatmul.mubr.f32.gmra.mxu0 %v280_v24  ;;  %774 = vmatmul.mubr.f32.gmra.mxu1 %v282_v25  ;;  %v344_v24 = vld [vmem:[%s1604_s7 + $0x2a0] sm:$0xff]  ;;  %v346_v25 = vld [vmem:[%s1604_s7 + $0x2b0] sm:$0xff] }
  0x98   : > { %553 = vmatprep.mubr.f32.mxu0 %v285_v26  ;;  %778 = vmatprep.mubr.f32.mxu1 %v287_v27  ;;  %v349_v26 = vld [vmem:[%s1604_s7 + $0x2c8] sm:$0xff]  ;;  %v351_v27 = vld [vmem:[%s1604_s7 + $0x2d8] sm:$0xff] }
  0x9b   : > { %554 = vmatmul.mubr.f32.gmra.mxu0 %v284_v28  ;;  %779 = vmatmul.mubr.f32.gmra.mxu1 %v286_v29  ;;  %v348_v28 = vld [vmem:[%s1604_s7 + $0x2c0] sm:$0xff]  ;;  %v350_v29 = vld [vmem:[%s1604_s7 + $0x2d0] sm:$0xff] }
  0x9c   : > { %558 = vmatprep.mubr.f32.mxu0 %v289_v30  ;;  %783 = vmatprep.mubr.f32.mxu1 %v291_v31  ;;  %v353_v30 = vld [vmem:[%s1604_s7 + $0x2e8] sm:$0xff]  ;;  %v355_v31 = vld [vmem:[%s1604_s7 + $0x2f8] sm:$0xff] }
  0x9f   : > { %559 = vmatmul.mubr.f32.gmra.mxu0 %v288_v32  ;;  %784 = vmatmul.mubr.f32.gmra.mxu1 %v290_v33  ;;  %v352_v32 = vld [vmem:[%s1604_s7 + $0x2e0] sm:$0xff]  ;;  %v354_v33 = vld [vmem:[%s1604_s7 + $0x2f0] sm:$0xff] }
  0xa0   : > { %563 = vmatprep.mubr.f32.mxu0 %v293_v34  ;;  %788 = vmatprep.mubr.f32.mxu1 %v295_v35  ;;  %v357_v34 = vld [vmem:[%s1604_s7 + $0x308] sm:$0xff]  ;;  %v359_v35 = vld [vmem:[%s1604_s7 + $0x318] sm:$0xff] }
  0xa3   : > { %564 = vmatmul.mubr.f32.gmra.mxu0 %v292_v36  ;;  %789 = vmatmul.mubr.f32.gmra.mxu1 %v294_v37  ;;  %v356_v36 = vld [vmem:[%s1604_s7 + $0x300] sm:$0xff]  ;;  %v358_v37 = vld [vmem:[%s1604_s7 + $0x310] sm:$0xff] }
  0xa4   : > { %568 = vmatprep.mubr.f32.mxu0 %v297_v38  ;;  %793 = vmatprep.mubr.f32.mxu1 %v299_v39  ;;  %v361_v38 = vld [vmem:[%s1604_s7 + $0x328] sm:$0xff]  ;;  %v363_v39 = vld [vmem:[%s1604_s7 + $0x338] sm:$0xff] }
  0xa7   : > { %569 = vmatmul.mubr.f32.gmra.mxu0 %v296_v40  ;;  %794 = vmatmul.mubr.f32.gmra.mxu1 %v298_v41  ;;  %v360_v40 = vld [vmem:[%s1604_s7 + $0x320] sm:$0xff]  ;;  %v362_v41 = vld [vmem:[%s1604_s7 + $0x330] sm:$0xff] }
  0xa8   : > { %573 = vmatprep.mubr.f32.mxu0 %v301_v42  ;;  %798 = vmatprep.mubr.f32.mxu1 %v303_v43  ;;  %v365_v42 = vld [vmem:[%s1604_s7 + $0x348] sm:$0xff]  ;;  %v367_v43 = vld [vmem:[%s1604_s7 + $0x358] sm:$0xff] }
  0xab   : > { %574 = vmatmul.mubr.f32.gmra.mxu0 %v300_v44  ;;  %799 = vmatmul.mubr.f32.gmra.mxu1 %v302_v45  ;;  %v364_v44 = vld [vmem:[%s1604_s7 + $0x340] sm:$0xff]  ;;  %v366_v45 = vld [vmem:[%s1604_s7 + $0x350] sm:$0xff] }
  0xac   : > { %578 = vmatprep.mubr.f32.mxu0 %v305_v46  ;;  %803 = vmatprep.mubr.f32.mxu1 %v307_v47  ;;  %v369_v46 = vld [vmem:[%s1604_s7 + $0x368] sm:$0xff]  ;;  %v371_v47 = vld [vmem:[%s1604_s7 + $0x378] sm:$0xff] }
  0xaf   : > { %579 = vmatmul.mubr.f32.gmra.mxu0 %v304_v48  ;;  %804 = vmatmul.mubr.f32.gmra.mxu1 %v306_v49  ;;  %v368_v48 = vld [vmem:[%s1604_s7 + $0x360] sm:$0xff]  ;;  %v370_v49 = vld [vmem:[%s1604_s7 + $0x370] sm:$0xff] }
  0xb0   : > { %583 = vmatprep.mubr.f32.mxu0 %v309_v50  ;;  %808 = vmatprep.mubr.f32.mxu1 %v311_v51  ;;  %v373_v50 = vld [vmem:[%s1604_s7 + $0x388] sm:$0xff]  ;;  %v375_v51 = vld [vmem:[%s1604_s7 + $0x398] sm:$0xff] }
  0xb3   : > { %584 = vmatmul.mubr.f32.gmra.mxu0 %v308_v52  ;;  %809 = vmatmul.mubr.f32.gmra.mxu1 %v310_v53  ;;  %v372_v52 = vld [vmem:[%s1604_s7 + $0x380] sm:$0xff]  ;;  %v374_v53 = vld [vmem:[%s1604_s7 + $0x390] sm:$0xff] }
  0xb4   : > { %588 = vmatprep.mubr.f32.mxu0 %v313_v54  ;;  %813 = vmatprep.mubr.f32.mxu1 %v315_v55  ;;  %v377_v54 = vld [vmem:[%s1604_s7 + $0x3a8] sm:$0xff]  ;;  %v379_v55 = vld [vmem:[%s1604_s7 + $0x3b8] sm:$0xff] }
  0xb7   : > { %589 = vmatmul.mubr.f32.gmra.mxu0 %v312_v56  ;;  %814 = vmatmul.mubr.f32.gmra.mxu1 %v314_v57  ;;  %v376_v56 = vld [vmem:[%s1604_s7 + $0x3a0] sm:$0xff]  ;;  %v378_v57 = vld [vmem:[%s1604_s7 + $0x3b0] sm:$0xff] }
  0xb8   : > { %593 = vmatprep.mubr.f32.mxu0 %v317_v58  ;;  %818 = vmatprep.mubr.f32.mxu1 %v319_v59  ;;  %v381_v58 = vld [vmem:[%s1604_s7 + $0x3c8] sm:$0xff]  ;;  %v383_v59 = vld [vmem:[%s1604_s7 + $0x3d8] sm:$0xff] }
  0xbb   : > { %594 = vmatmul.mubr.f32.gmra.mxu0 %v316_v60  ;;  %819 = vmatmul.mubr.f32.gmra.mxu1 %v318_v61  ;;  %v380_v60 = vld [vmem:[%s1604_s7 + $0x3c0] sm:$0xff]  ;;  %v382_v61 = vld [vmem:[%s1604_s7 + $0x3d0] sm:$0xff] }
  0xbc   : > { %598 = vmatprep.mubr.f32.mxu0 %v321_v62  ;;  %823 = vmatprep.mubr.f32.mxu1 %v323_v63  ;;  %v385_v62 = vld [vmem:[%s1604_s7 + $0x3e8] sm:$0xff]  ;;  %v387_v63 = vld [vmem:[%s1604_s7 + $0x3f8] sm:$0xff] }
  0xbf   : > { %599 = vmatmul.mubr.f32.gmra.mxu0 %v320_v0  ;;  %824 = vmatmul.mubr.f32.gmra.mxu1 %v322_v2  ;;  %v384_v0 = vld [vmem:[%s1604_s7 + $0x3e0] sm:$0xff]  ;;  %v386_v2 = vld [vmem:[%s1604_s7 + $0x3f0] sm:$0xff] }
  0xc0   : > { %603 = vmatprep.mubr.f32.mxu0 %v325_v3  ;;  %828 = vmatprep.mubr.f32.mxu1 %v327_v4  ;;  %v1997_v3 = vld [vmem:[%s2191_s2] ss:$0 sm:$0xff] }
  0xc3   : > { %604 = vmatmul.mubr.f32.gmra.mxu0 %v324_v5  ;;  %829 = vmatmul.mubr.f32.gmra.mxu1 %v326_v6 }
  0xc4   : > { %608 = vmatprep.mubr.f32.mxu0 %v329_v7  ;;  %833 = vmatprep.mubr.f32.mxu1 %v331_v8 }
  0xc7   : > { %609 = vmatmul.mubr.f32.gmra.mxu0 %v328_v9  ;;  %834 = vmatmul.mubr.f32.gmra.mxu1 %v330_v1 }
  0xc8   : > { %613 = vmatprep.mubr.f32.mxu0 %v333_v10  ;;  %838 = vmatprep.mubr.f32.mxu1 %v335_v11 }
  0xcb   : > { %614 = vmatmul.mubr.f32.gmra.mxu0 %v332_v12  ;;  %839 = vmatmul.mubr.f32.gmra.mxu1 %v334_v13 }
  0xcc   : > { %618 = vmatprep.mubr.f32.mxu0 %v337_v14  ;;  %843 = vmatprep.mubr.f32.mxu1 %v339_v15 }
  0xcf   : > { %619 = vmatmul.mubr.f32.gmra.mxu0 %v336_v16  ;;  %844 = vmatmul.mubr.f32.gmra.mxu1 %v338_v17 }
  0xd0   : > { %623 = vmatprep.mubr.f32.mxu0 %v341_v18  ;;  %848 = vmatprep.mubr.f32.mxu1 %v343_v19 }
  0xd3   : > { %624 = vmatmul.mubr.f32.gmra.mxu0 %v340_v20  ;;  %849 = vmatmul.mubr.f32.gmra.mxu1 %v342_v21 }
  0xd4   : > { %628 = vmatprep.mubr.f32.mxu0 %v345_v22  ;;  %853 = vmatprep.mubr.f32.mxu1 %v347_v23 }
  0xd7   : > { %629 = vmatmul.mubr.f32.gmra.mxu0 %v344_v24  ;;  %854 = vmatmul.mubr.f32.gmra.mxu1 %v346_v25 }
  0xd8   : > { %633 = vmatprep.mubr.f32.mxu0 %v349_v26  ;;  %858 = vmatprep.mubr.f32.mxu1 %v351_v27 }
  0xdb   : > { %634 = vmatmul.mubr.f32.gmra.mxu0 %v348_v28  ;;  %859 = vmatmul.mubr.f32.gmra.mxu1 %v350_v29 }
  0xdc   : > { %638 = vmatprep.mubr.f32.mxu0 %v353_v30  ;;  %863 = vmatprep.mubr.f32.mxu1 %v355_v31 }
  0xdf   : > { %639 = vmatmul.mubr.f32.gmra.mxu0 %v352_v32  ;;  %864 = vmatmul.mubr.f32.gmra.mxu1 %v354_v33 }
  0xe0   : > { %643 = vmatprep.mubr.f32.mxu0 %v357_v34  ;;  %868 = vmatprep.mubr.f32.mxu1 %v359_v35 }
  0xe3   : > { %644 = vmatmul.mubr.f32.gmra.mxu0 %v356_v36  ;;  %869 = vmatmul.mubr.f32.gmra.mxu1 %v358_v37 }
  0xe4   : > { %648 = vmatprep.mubr.f32.mxu0 %v361_v38  ;;  %873 = vmatprep.mubr.f32.mxu1 %v363_v39 }
  0xe7   : > { %649 = vmatmul.mubr.f32.gmra.mxu0 %v360_v40  ;;  %874 = vmatmul.mubr.f32.gmra.mxu1 %v362_v41 }
  0xe8   : > { %653 = vmatprep.mubr.f32.mxu0 %v365_v42  ;;  %878 = vmatprep.mubr.f32.mxu1 %v367_v43 }
  0xeb   : > { %654 = vmatmul.mubr.f32.gmra.mxu0 %v364_v44  ;;  %879 = vmatmul.mubr.f32.gmra.mxu1 %v366_v45 }
  0xec   : > { %658 = vmatprep.mubr.f32.mxu0 %v369_v46  ;;  %883 = vmatprep.mubr.f32.mxu1 %v371_v47 }
  0xef   : > { %659 = vmatmul.mubr.f32.gmra.mxu0 %v368_v48  ;;  %884 = vmatmul.mubr.f32.gmra.mxu1 %v370_v49 }
  0xf0   : > { %663 = vmatprep.mubr.f32.mxu0 %v373_v50  ;;  %888 = vmatprep.mubr.f32.mxu1 %v375_v51 }
  0xf3   : > { %664 = vmatmul.mubr.f32.gmra.mxu0 %v372_v52  ;;  %889 = vmatmul.mubr.f32.gmra.mxu1 %v374_v53 }
  0xf4   : > { %668 = vmatprep.mubr.f32.mxu0 %v377_v54  ;;  %893 = vmatprep.mubr.f32.mxu1 %v379_v55 }
  0xf7   : > { %669 = vmatmul.mubr.f32.gmra.mxu0 %v376_v56  ;;  %894 = vmatmul.mubr.f32.gmra.mxu1 %v378_v57 }
  0xf8   : > { %673 = vmatprep.mubr.f32.mxu0 %v381_v58  ;;  %898 = vmatprep.mubr.f32.mxu1 %v383_v59 }
  0xfb   : > { %674 = vmatmul.mubr.f32.gmra.mxu0 %v380_v60  ;;  %899 = vmatmul.mubr.f32.gmra.mxu1 %v382_v61 }
  0xfc   : > { %678 = vmatprep.mubr.f32.mxu0 %v385_v62  ;;  %903 = vmatprep.mubr.f32.mxu1 %v387_v63 }
  0xff   : > { %679 = vmatmul.mubr.f32.gmra.mxu0 %v384_v0  ;;  %904 = vmatmul.mubr.f32.gmra.mxu1 %v386_v2 }
 0x143   : > { %v525_v4 = vpop.f32.mrf.mxu0  ;;  %v750_v5 = vpop.f32.mrf.mxu1 }
 0x144   : > { %v526_v6 = vadd.f32 %v1997_v3, %v525_v4 }
 0x145   : > { %v527_v7 = vpop.f32.mrf.mxu0  ;;  %v752_v8 = vpop.f32.mrf.mxu1 }
 0x146   : > { %v2000_v9 = vadd.f32 %v750_v5, %v526_v6 }
 0x147   : > { %v530_v1 = vpop.f32.mrf.mxu0  ;;  %v755_v10 = vpop.f32.mrf.mxu1 }
 0x148   : > { %v531_v11 = vadd.f32 %v1997_v3, %v530_v1 }
 0x149   : > { %v532_v12 = vpop.f32.mrf.mxu0  ;;  %v757_v13 = vpop.f32.mrf.mxu1 }
 0x14a   : > { %v2003_v14 = vadd.f32 %v755_v10, %v531_v11 }
 0x14b   : > { %v535_v15 = vpop.f32.mrf.mxu0  ;;  %v760_v16 = vpop.f32.mrf.mxu1 }
 0x14c   : > { %v536_v17 = vadd.f32 %v1997_v3, %v535_v15 }
 0x14d   : > { %v537_v18 = vpop.f32.mrf.mxu0  ;;  %v762_v19 = vpop.f32.mrf.mxu1 }
 0x14e   : > { %v2006_v20 = vadd.f32 %v760_v16, %v536_v17 }
 0x14f   : > { %v540_v21 = vpop.f32.mrf.mxu0  ;;  %v765_v22 = vpop.f32.mrf.mxu1 }
 0x150   : > { %v541_v23 = vadd.f32 %v1997_v3, %v540_v21 }
 0x151   : > { %v542_v24 = vpop.f32.mrf.mxu0  ;;  %v767_v25 = vpop.f32.mrf.mxu1 }
 0x152   : > { %v2009_v26 = vadd.f32 %v765_v22, %v541_v23 }
 0x153   : > { %v545_v27 = vpop.f32.mrf.mxu0  ;;  %v770_v28 = vpop.f32.mrf.mxu1 }
 0x154   : > { %v546_v29 = vadd.f32 %v1997_v3, %v545_v27 }
 0x155   : > { %v547_v30 = vpop.f32.mrf.mxu0  ;;  %v772_v31 = vpop.f32.mrf.mxu1 }
 0x156   : > { %v2012_v32 = vadd.f32 %v770_v28, %v546_v29 }
 0x157   : > { %v550_v33 = vpop.f32.mrf.mxu0  ;;  %v775_v34 = vpop.f32.mrf.mxu1 }
 0x158   : > { %v551_v35 = vadd.f32 %v1997_v3, %v550_v33 }
 0x159   : > { %v552_v36 = vpop.f32.mrf.mxu0  ;;  %v777_v37 = vpop.f32.mrf.mxu1 }
 0x15a   : > { %v2015_v38 = vadd.f32 %v775_v34, %v551_v35 }
 0x15b   : > { %v555_v39 = vpop.f32.mrf.mxu0  ;;  %v780_v40 = vpop.f32.mrf.mxu1 }
 0x15c   : > { %v556_v41 = vadd.f32 %v1997_v3, %v555_v39 }
 0x15d   : > { %v557_v42 = vpop.f32.mrf.mxu0  ;;  %v782_v43 = vpop.f32.mrf.mxu1 }
 0x15e   : > { %v2018_v44 = vadd.f32 %v780_v40, %v556_v41 }
 0x15f   : > { %v560_v45 = vpop.f32.mrf.mxu0  ;;  %v785_v46 = vpop.f32.mrf.mxu1 }
 0x160   : > { %v561_v47 = vadd.f32 %v1997_v3, %v560_v45  ;;  %v2050_v45 = vld [vmem:[%s2192_s3] sm:$0x1] }
 0x161   : > { %v562_v48 = vpop.f32.mrf.mxu0  ;;  %v787_v49 = vpop.f32.mrf.mxu1  ;;  %1321 = vmatprep.mubr.msk.f32.mxu0 %vm952_vm0, %v2050_v45 }
 0x162   : > { %v2021_v50 = vadd.f32 %v785_v46, %v561_v47 }
 0x163   : > { %v565_v51 = vpop.f32.mrf.mxu0  ;;  %v790_v52 = vpop.f32.mrf.mxu1 }
 0x164   : > { %v566_v53 = vadd.f32 %v1997_v3, %v565_v51  ;;  %v942_v51 = vld [vmem:[#allocation2] sm:$0x1] }
 0x165   : > { %v567_v54 = vpop.f32.mrf.mxu0  ;;  %v792_v55 = vpop.f32.mrf.mxu1 }
 0x166   : > { %v2024_v56 = vadd.f32 %v790_v52, %v566_v53  ;;  %v1465_v54 = vmov 0  }
 0x167   : > { %v570_v57 = vpop.f32.mrf.mxu0  ;;  %v795_v58 = vpop.f32.mrf.mxu1  ;;  %1368 = vset.pattern.permute.xlu0 %v1465_v54 }
 0x168   : > { %v571_v59 = vadd.f32 %v1997_v3, %v570_v57  ;;  %945 = vperm.xlu0 %1368, %v942_v51  }
 0x169   : > { %v572_v60 = vpop.f32.mrf.mxu0  ;;  %v797_v61 = vpop.f32.mrf.mxu1 }
 0x16a   : > { %v2027_v62 = vadd.f32 %v795_v58, %v571_v59 }
 0x16b   : > { %v575_v63 = vpop.f32.mrf.mxu0  ;;  %v800_v0 = vpop.f32.mrf.mxu1 }
 0x16c   : > { %v576_v2 = vadd.f32 %v1997_v3, %v575_v63 }
 0x16d   : > { %v577_v4 = vpop.f32.mrf.mxu0  ;;  %v802_v5 = vpop.f32.mrf.mxu1 }
 0x16e   : > { %v2030_v6 = vadd.f32 %v800_v0, %v576_v2 }
 0x16f   : > { %v580_v7 = vpop.f32.mrf.mxu0  ;;  %v805_v8 = vpop.f32.mrf.mxu1 }
 0x170   : > { %v581_v1 = vadd.f32 %v1997_v3, %v580_v7 }
 0x171   : > { %v582_v10 = vpop.f32.mrf.mxu0  ;;  %v807_v11 = vpop.f32.mrf.mxu1 }
 0x172   : > { %v2033_v12 = vadd.f32 %v805_v8, %v581_v1 }
 0x173   : > { %v585_v13 = vpop.f32.mrf.mxu0  ;;  %v810_v15 = vpop.f32.mrf.mxu1 }
 0x174   : > { %v586_v16 = vadd.f32 %v1997_v3, %v585_v13 }
 0x175   : > { %v587_v17 = vpop.f32.mrf.mxu0  ;;  %v812_v18 = vpop.f32.mrf.mxu1 }
 0x176   : > { %v2036_v19 = vadd.f32 %v810_v15, %v586_v16 }
 0x177   : > { %v590_v21 = vpop.f32.mrf.mxu0  ;;  %v815_v22 = vpop.f32.mrf.mxu1 }
 0x178   : > { %v591_v23 = vadd.f32 %v1997_v3, %v590_v21 }
 0x179   : > { %v592_v24 = vpop.f32.mrf.mxu0  ;;  %v817_v25 = vpop.f32.mrf.mxu1 }
 0x17a   : > { %v2039_v27 = vadd.f32 %v815_v22, %v591_v23 }
 0x17b   : > { %v595_v28 = vpop.f32.mrf.mxu0  ;;  %v820_v29 = vpop.f32.mrf.mxu1 }
 0x17c   : > { %v596_v30 = vadd.f32 %v1997_v3, %v595_v28 }
 0x17d   : > { %v597_v31 = vpop.f32.mrf.mxu0  ;;  %v822_v33 = vpop.f32.mrf.mxu1 }
 0x17e   : > { %v2042_v34 = vadd.f32 %v820_v29, %v596_v30 }
 0x17f   : > { %v600_v35 = vpop.f32.mrf.mxu0  ;;  %v825_v36 = vpop.f32.mrf.mxu1 }
 0x180   : > { %v601_v37 = vadd.f32 %v1997_v3, %v600_v35 }
 0x181   : > { %v602_v39 = vpop.f32.mrf.mxu0  ;;  %v827_v40 = vpop.f32.mrf.mxu1 }
 0x182   : > { %v2045_v41 = vadd.f32 %v825_v36, %v601_v37 }
 0x183   : > { %v605_v42 = vpop.f32.mrf.mxu0  ;;  %v830_v43 = vpop.f32.mrf.mxu1 }
 0x184   : > { %v606_v46 = vadd.f32 %v1997_v3, %v605_v42 }
 0x185   : > { %v607_v47 = vpop.f32.mrf.mxu0  ;;  %v832_v48 = vpop.f32.mrf.mxu1 }
 0x186   : > { %v2055_v49 = vadd.f32 %v830_v43, %v606_v46 }
 0x187   : > { %v610_v52 = vpop.f32.mrf.mxu0  ;;  %v835_v53 = vpop.f32.mrf.mxu1 }
 0x188   : > { %v611_v55 = vadd.f32 %v1997_v3, %v610_v52 }
 0x189   : > { %v612_v57 = vpop.f32.mrf.mxu0  ;;  %v837_v58 = vpop.f32.mrf.mxu1 }
 0x18a   : > { %v2058_v59 = vadd.f32 %v835_v53, %v611_v55 }
 0x18b   : > { %v615_v60 = vpop.f32.mrf.mxu0  ;;  %v840_v61 = vpop.f32.mrf.mxu1 }
 0x18c   : > { %v616_v63 = vadd.f32 %v1997_v3, %v615_v60 }
 0x18d   : > { %v617_v0 = vpop.f32.mrf.mxu0  ;;  %v842_v2 = vpop.f32.mrf.mxu1 }
 0x18e   : > { %v2061_v4 = vadd.f32 %v840_v61, %v616_v63 }
 0x18f   : > { %v620_v5 = vpop.f32.mrf.mxu0  ;;  %v845_v7 = vpop.f32.mrf.mxu1 }
 0x190   : > { %v621_v8 = vadd.f32 %v1997_v3, %v620_v5 }
 0x191   : > { %v622_v1 = vpop.f32.mrf.mxu0  ;;  %v847_v10 = vpop.f32.mrf.mxu1 }
 0x192   : > { %v2064_v11 = vadd.f32 %v845_v7, %v621_v8 }
 0x193   : > { %v625_v13 = vpop.f32.mrf.mxu0  ;;  %v850_v15 = vpop.f32.mrf.mxu1 }
 0x194   : > { %v626_v16 = vadd.f32 %v1997_v3, %v625_v13 }
 0x195   : > { %v627_v17 = vpop.f32.mrf.mxu0  ;;  %v852_v18 = vpop.f32.mrf.mxu1 }
 0x196   : > { %v2067_v21 = vadd.f32 %v850_v15, %v626_v16 }
 0x197   : > { %v630_v22 = vpop.f32.mrf.mxu0  ;;  %v855_v23 = vpop.f32.mrf.mxu1 }
 0x198   : > { %v631_v24 = vadd.f32 %v1997_v3, %v630_v22 }
 0x199   : > { %v632_v25 = vpop.f32.mrf.mxu0  ;;  %v857_v28 = vpop.f32.mrf.mxu1 }
 0x19a   : > { %v2070_v29 = vadd.f32 %v855_v23, %v631_v24 }
 0x19b   : > { %v635_v30 = vpop.f32.mrf.mxu0  ;;  %v860_v31 = vpop.f32.mrf.mxu1 }
 0x19c   : > { %v636_v33 = vadd.f32 %v1997_v3, %v635_v30 }
 0x19d   : > { %v637_v35 = vpop.f32.mrf.mxu0  ;;  %v862_v36 = vpop.f32.mrf.mxu1 }
 0x19e   : > { %v2073_v37 = vadd.f32 %v860_v31, %v636_v33 }
 0x19f   : > { %v2075_v39 = vpop.f32.mrf.mxu0  ;;  %v2077_v40 = vpop.f32.mrf.mxu1 }
 0x1a1   : > { %v642_v42 = vpop.f32.mrf.mxu0  ;;  %v867_v43 = vpop.f32.mrf.mxu1 }
 0x1a3   : > { %v2079_v46 = vpop.f32.mrf.mxu0  ;;  %v2081_v47 = vpop.f32.mrf.mxu1 }
 0x1a5   : > { %v647_v48 = vpop.f32.mrf.mxu0  ;;  %v872_v51 = vpop.f32.mrf.mxu1 }
 0x1a6   : > { %v924_v51 = vmax.f32 %v2045_v41, 0.0  ;;  %v922_v41 = vmax.f32 %v2039_v27, 0.0  ;;  %v920_v27 = vmax.f32 %v2033_v12, 0.0  ;;  %v918_v12 = vmax.f32 %v2027_v62, 0.0 }
 0x1a7   : > { %v650_v52 = vpop.f32.mrf.mxu0  ;;  %v875_v53 = vpop.f32.mrf.mxu1  ;;  %v915_v62 = vmax.f32 %v2018_v44, 0.0  ;;  %v912_v44 = vmax.f32 %v2009_v26, 0.0  ;;  %v909_v26 = vmax.f32 %v2000_v9, 0.0 }
 0x1a9   : > { %v652_v54 = vpop.f32.mrf.mxu0  ;;  %v877_v55 = vpop.f32.mrf.mxu1 }
 0x1ab   : > { %v655_v57 = vpop.f32.mrf.mxu0  ;;  %v880_v58 = vpop.f32.mrf.mxu1 }
 0x1ad   : > { %v657_v60 = vpop.f32.mrf.mxu0  ;;  %v882_v61 = vpop.f32.mrf.mxu1 }
 0x1ae   : > { %v923_v61 = vmax.f32 %v2042_v34, 0.0  ;;  %v921_v34 = vmax.f32 %v2036_v19, 0.0  ;;  %v919_v19 = vmax.f32 %v2030_v6, 0.0  ;;  %v917_v6 = vmax.f32 %v2024_v56, 0.0 }
 0x1af   : > { %v660_v63 = vpop.f32.mrf.mxu0  ;;  %v885_v0 = vpop.f32.mrf.mxu1  ;;  %v914_v56 = vmax.f32 %v2015_v38, 0.0  ;;  %v911_v38 = vmax.f32 %v2006_v20, 0.0  ;;  %v948_v20 = vlaneseq }
 0x1b1   : > { %v662_v2 = vpop.f32.mrf.mxu0  ;;  %v887_v5 = vpop.f32.mrf.mxu1  ;;  %vm1143_vm1 = vcmp.lt.s32.totalorder %v948_v20, 256 }
 0x1b2   : > { %v661_v2 = vadd.f32 %v1997_v3, %v660_v63  ;;  %v651_v63 = vadd.f32 %v1997_v3, %v650_v52  ;;  %v641_v52 = vadd.f32 %v1997_v3, %v2075_v39  ;;  %v931_v39 = vmax.f32 %v2073_v37, 0.0 }
 0x1b3   : > { %v665_v7 = vpop.f32.mrf.mxu0  ;;  %v890_v8 = vpop.f32.mrf.mxu1  ;;  %v928_v37 = vmax.f32 %v2064_v11, 0.0  ;;  %v925_v11 = vmax.f32 %v2055_v49, 0.0 }
 0x1b4   : > { %v666_v54 = vadd.f32 %v1997_v3, %v665_v7  ;;  %v656_v7 = vadd.f32 %v1997_v3, %v655_v57  ;;  %v646_v57 = vadd.f32 %v1997_v3, %v2079_v46  ;;  %v866_v46 = vadd.f32 %v2077_v40, %v641_v52 }
 0x1b5   : > { %v667_v1 = vpop.f32.mrf.mxu0  ;;  %v892_v10 = vpop.f32.mrf.mxu1  ;;  %v930_v40 = vmax.f32 %v2070_v29, 0.0  ;;  %v927_v29 = vmax.f32 %v2061_v4, 0.0 }
 0x1b6   : > { %v891_v5 = vadd.f32 %v890_v8, %v666_v54  ;;  %v886_v10 = vadd.f32 %v885_v0, %v661_v2  ;;  %v881_v8 = vadd.f32 %v880_v58, %v656_v7  ;;  %v876_v0 = vadd.f32 %v875_v53, %v651_v63 }
 0x1b7   : > { %v670_v13 = vpop.f32.mrf.mxu0  ;;  %v895_v15 = vpop.f32.mrf.mxu1  ;;  %v871_v58 = vadd.f32 %v2081_v47, %v646_v57  ;;  %v929_v47 = vmax.f32 %v2067_v21, 0.0  ;;  %v926_v21 = vmax.f32 %v2058_v59, 0.0  ;;  %v949_v59 = vshrl.u32 %v948_v20, 7 }
 0x1b8   : > { %v671_v36 = vadd.f32 %v1997_v3, %v670_v13  ;;  %v937_v13 = vmax.f32 %v891_v5, 0.0 }
 0x1b9   : > { %v672_v16 = vpop.f32.mrf.mxu0  ;;  %v897_v17 = vpop.f32.mrf.mxu1  ;;  %v933_v53 = vmax.f32 %v871_v58, 0.0  ;;  %v950_v4 = vsub.s32 0, %v949_v59 }
 0x1ba   : > { %v896_v55 = vadd.f32 %v895_v15, %v671_v36  ;;  %v936_v15 = vmax.f32 %v886_v10, 0.0  ;;  %v935_v16 = vmax.f32 %v881_v8, 0.0  ;;  %v934_v17 = vmax.f32 %v876_v0, 0.0 }
 0x1bb   : > { %v675_v18 = vpop.f32.mrf.mxu0  ;;  %v900_v22 = vpop.f32.mrf.mxu1 }
 0x1bc   : > { %v676_v25 = vadd.f32 %v1997_v3, %v675_v18  ;;  %v938_v1 = vmax.f32 %v896_v55, 0.0  ;;  %v932_v18 = vmax.f32 %v866_v46, 0.0 }
 0x1bd   : > { %v677_v23 = vpop.f32.mrf.mxu0  ;;  %v902_v24 = vpop.f32.mrf.mxu1 }
 0x1be   : > { %v901_v42 = vadd.f32 %v900_v22, %v676_v25  ;;  %v1466_v22 = vmov 1966171168  }
 0x1bf   : > { %v680_v28 = vpop.f32.mrf.mxu0  ;;  %v905_v30 = vpop.f32.mrf.mxu1 }
 0x1c0   : > { %v681_v31 = vadd.f32 %v1997_v3, %v680_v28  ;;  %v939_v60 = vmax.f32 %v901_v42, 0.0  ;;  %v916_v3 = vmax.f32 %v2021_v50, 0.0  ;;  %v913_v50 = vmax.f32 %v2012_v32, 0.0 }
 0x1c1   : > { %v682_v33 = vpop.f32.mrf.mxu0  ;;  %v907_v35 = vpop.f32.mrf.mxu1  ;;  %v910_v32 = vmax.f32 %v2003_v14, 0.0  ;;  %v1127_v14 = vunpack.c.l.s4 %v1466_v22 }
 0x1c2   : > { %v906_v43 = vadd.f32 %v905_v30, %v681_v31 }
 0x1c3   : > { %v1128_v49 = vunpack.c.0.s8 %v1127_v14 }
 0x1c4   : > { %v940_v48 = vmax.f32 %v906_v43, 0.0 }
 0x1c5   : > { %v1131_v31 = vsub.s32 %v1128_v49, %v949_v59 }
 0x1c6   : > { %1289 = vmatprep.subr.msk.mxu0 %vm952_vm0, %v940_v48 }
 0x1c7   : > { %1290 = vmatpush3.xpose.msk.msra.mxu0 %vm952_vm0, %v924_v51 }
 0x1c8   : > { %1291 = vmatprep.subr.msk.mxu0 %vm952_vm0, %v939_v60 }
 0x1cb   : > { %1292 = vmatpush3.xpose.msk.msra.mxu0 %vm952_vm0, %v923_v61 }
 0x1cc   : > { %1293 = vmatprep.subr.msk.mxu0 %vm952_vm0, %v938_v1 }
 0x1cf   : > { %1294 = vmatpush3.xpose.msk.msra.mxu0 %vm952_vm0, %v922_v41 }
 0x1d0   : > { %1295 = vmatprep.subr.msk.mxu0 %vm952_vm0, %v937_v13 }
 0x1d3   : > { %1296 = vmatpush3.xpose.msk.msra.mxu0 %vm952_vm0, %v921_v34 }
 0x1d4   : > { %1297 = vmatprep.subr.msk.mxu0 %vm952_vm0, %v936_v15 }
 0x1d7   : > { %1298 = vmatpush3.xpose.msk.msra.mxu0 %vm952_vm0, %v920_v27 }
 0x1d8   : > { %1299 = vmatprep.subr.msk.mxu0 %vm952_vm0, %v935_v16 }
 0x1db   : > { %1300 = vmatpush3.xpose.msk.msra.mxu0 %vm952_vm0, %v919_v19 }
 0x1dc   : > { %1301 = vmatprep.subr.msk.mxu0 %vm952_vm0, %v934_v17 }
 0x1df   : > { %1302 = vmatpush3.xpose.msk.msra.mxu0 %vm952_vm0, %v918_v12 }
 0x1e0   : > { %1303 = vmatprep.subr.msk.mxu0 %vm952_vm0, %v933_v53 }
 0x1e3   : > { %1304 = vmatpush3.xpose.msk.msra.mxu0 %vm952_vm0, %v917_v6  ;;  %v946_v23 = vpop.permute.xlu0 %945 }
 0x1e4   : > { %1305 = vmatprep.subr.msk.mxu0 %vm952_vm0, %v932_v18  ;;  %v951_v24 = vrot.slane %v946_v23, %v950_v4 }
 0x1e7   : > { %1306 = vmatpush3.xpose.msk.msra.mxu0 %vm952_vm0, %v916_v3 }
 0x1e8   : > { %1307 = vmatprep.subr.msk.mxu0 %vm952_vm0, %v931_v39 }
 0x1eb   : > { %1308 = vmatpush3.xpose.msk.msra.mxu0 %vm952_vm0, %v915_v62 }
 0x1ec   : > { %1309 = vmatprep.subr.msk.mxu0 %vm952_vm0, %v930_v40 }
 0x1ef   : > { %1310 = vmatpush3.xpose.msk.msra.mxu0 %vm952_vm0, %v914_v56 }
 0x1f0   : > { %1311 = vmatprep.subr.msk.mxu0 %vm952_vm0, %v929_v47 }
 0x1f3   : > { %1312 = vmatpush3.xpose.msk.msra.mxu0 %vm952_vm0, %v913_v50 }
 0x1f4   : > { %1313 = vmatprep.subr.msk.mxu0 %vm952_vm0, %v928_v37 }
 0x1f7   : > { %1314 = vmatpush3.xpose.msk.msra.mxu0 %vm952_vm0, %v912_v44 }
 0x1f8   : > { %1315 = vmatprep.subr.msk.mxu0 %vm952_vm0, %v927_v29 }
 0x1fb   : > { %1316 = vmatpush3.xpose.msk.msra.mxu0 %vm952_vm0, %v911_v38 }
 0x1fc   : > { %1317 = vmatprep.subr.msk.mxu0 %vm952_vm0, %v926_v21 }
 0x1ff   : > { %1318 = vmatpush3.xpose.msk.msra.mxu0 %vm952_vm0, %v910_v32 }
 0x200   : > { %1319 = vmatprep.subr.msk.mxu0 %vm952_vm0, %v925_v11 }
 0x203   : > { %1320 = vmatpush3.xpose.msk.msra.mxu0 %vm952_vm0, %v909_v26 }
 0x206   : > { %1322 = vmatmul.mubr.msk.f32.vlgmr.msra.gmra.mxu0 %vm952_vm0, %v2050_v45 }
 0x2c6   : > { %v1118_v25 = vpop.f32.mrf.mxu0 }
 0x2c7   : > { %v1119_v30 = vadd.f32 %v1118_v25, %v951_v24 }
 0x2c8   : > { %v1120_v28 = vpop.f32.mrf.mxu0 }
 0x2c9   : > { %v1121_v9 = vadd.f32 %v1120_v28, %v951_v24 }
 0x2cb   : > { %v1125_v33 = vcombine.low %v1119_v30, %v1121_v9 }
 0x2cd   : > { %v1132_v45 = vrot.slane %v1125_v33, %v1131_v31 }
 0x2cf   : > { %v1139_v35 = vrot.slane %v1132_v45, %v1131_v31 }
 0x2d1   : > { %1145 = vst.msk [vmem:[%s252_s26] sm:$0x3] %vm1143_vm1, %v1139_v35 }
 0x2d2   : > { %1408 = shalt.err (!%p1405_p12)
}
 0x2d3   : > { %s1409_s10 = scalar_lea.hbm %s1159_s18, 32  ;;  %s1413_s14 = scalar_lea.hbm %s2194_s5, 64 }
 0x2d4   : > { %p1410_p0 = scmp.ne.s32.totalorder %s1159_s18, %s1409_s10  ;;  %p1414_p2 = scmp.lt.s32.totalorder %s1159_s18, %s2194_s5 }
 0x2d5   : > { %p1415_p4 = scmp.lt.s32.totalorder %s1413_s14, %s1409_s10 }
 0x2d6   : > { %p1411_p1 = pnand %p1410_p0, %p1545_p9 }
 0x2d7   : > { %p1416_p5 = por %p1415_p4, %p1414_p2 }
 0x2d8   : > { %p1412_p3 = pneg %p1411_p1 }
 0x2da   : > { %p1417_p6 = pnand %p1416_p5, %p1412_p3 }
 0x2dc   : > { %1420 = shalt.err (!%p1417_p6)
}
 0x2dd   : > { %1324 = dma.vmem_to_hbm [thread:$0]  (%p1545_p9), %s1162_s27, 32, %s1159_s18, %s1147_s19  }
 0x2de PF: > { %s1173_s16 = sand.u32 1, %s1447_s20   ;;  %p2199_p10 = scmp.ne.s32.totalorder %s2198_s6, 0 }
 0x2df   : > { %p2200_p11 = scmp.ge.s32.totalorder %s1459_s23, 2  ;;  %s1174_s17 = scalar_lea.sflag [#allocation5], %s1173_s16 }
 0x2e1   : > { %p1327_p13 = pnand %p2200_p11, %p2199_p10 }
 0x2e3   : > { %p1328_p7 = pneg %p1327_p13 }
 0x2e5   : > { %1442 = dma.done.wait (%p1328_p7), %s1174_s17, 32  }
 0x2e6   : > { %1444 = vsyncadd (%p1328_p7), %s1174_s17, 4294967264  ;;  %p20_p8 = scmp.ge.s32.totalorder %s1526_s25, 4   ;;  %s2201_s20 = smov %s1451_s21 }
 0x2e7   : > { %s2202_s21 = smov %s1455_s22  ;;  %s2203_s22 = smov %s1538_s28 }
 0x2e8   : > { %s2204_s23 = smov %s1526_s25  ;;  %22 = sbr.rel (!%p20_p8) target bundleno = 8 (0x8), region = 85 }
 0x2ed   :  { %1179 = vsyncpa [#allocation4], 1 }
 0x2ee   :  { %1181 = vsyncpa [#allocation4 + $0x1], 1 }
 0x2ef   :  { %1182 = vsyncpa [#allocation5], 1 }
 0x2f0   :  { %1184 = vsyncpa [#allocation5 + $0x1], 1 }

</bundles_post_ra>
